<compile_context>
chip_gen: v5e
topology: v5e:2x2
jax: 0.10.0
libtpu: 0.0.40
codegen_flags: <defaults>
</compile_context>

<pallas_src>
import jax
import jax.numpy as jnp
from jax.experimental import pallas as pl
from jax.experimental.pallas import tpu as pltpu

EPS = 1e-12  # torch.nn.functional.normalize default eps


def _round_up(v, m):
    return (v + m - 1) // m * m


def _eaa_kernel(x_ref, wqk_ref, bqk_ref, wg_ref, wp_ref, bp_ref, wf_ref,
                bf_ref, o_ref):
    Bt, N, Din = x_ref.shape
    Dh_p = wp_ref.shape[0]
    Do_p = o_ref.shape[-1]
    mm_dtype = wqk_ref.dtype

    # Flatten batch tile into the matmul M dimension.
    x2 = x_ref[...].reshape(Bt * N, Din)

    # Fused query/key projection: one MXU matmul (f32 accumulate), split at a
    # 128-lane boundary.
    qk = jnp.dot(x2, wqk_ref[...], preferred_element_type=jnp.float32)
    qk = qk + bqk_ref[...]
    q = qk[:, :Dh_p]
    k = qk[:, Dh_p:]

    # F.normalize(dim=-1): x / max(||x||, eps) == x * rsqrt(max(sum(x^2), eps^2)).
    # rsqrt runs on the EUP slot, which is otherwise idle here.
    q = q * jax.lax.rsqrt(jnp.maximum(jnp.sum(q * q, axis=-1, keepdims=True),
                                      EPS * EPS))
    k = k * jax.lax.rsqrt(jnp.maximum(jnp.sum(k * k, axis=-1, keepdims=True),
                                      EPS * EPS))

    # query_weight * scale_factor; token_dim**-0.5 is already folded into wg.
    A = jnp.sum(q * wg_ref[...], axis=-1, keepdims=True)          # (Bt*N, 1)

    # F.normalize(A, dim=1): L2 over the token axis, per batch element.
    A3 = A.reshape(Bt, N, 1)
    A3 = A3 * jax.lax.rsqrt(
        jnp.maximum(jnp.sum(A3 * A3, axis=1, keepdims=True), EPS * EPS))

    q3 = q.reshape(Bt, N, Dh_p)
    k3 = k.reshape(Bt, N, Dh_p)
    G = jnp.sum(A3 * q3, axis=1, keepdims=True)                   # (Bt, 1, Dh_p)
    gk = (G * k3).reshape(Bt * N, Dh_p)

    out = jnp.dot(gk.astype(mm_dtype), wp_ref[...],
                  preferred_element_type=jnp.float32) + bp_ref[...]
    out = out + q
    out = jnp.dot(out.astype(mm_dtype), wf_ref[...],
                  preferred_element_type=jnp.float32) + bf_ref[...]
    o_ref[...] = out.reshape(Bt, N, Do_p).astype(o_ref.dtype)


def _choose_bt(B, N, row_bytes, budget_bytes=8 << 20):
    """Largest divisor of B whose tile fits the budget, preferring >= 2 grid
    steps (so both v7x TensorCores get work when B >= 2)."""
    max_bt = max(1, budget_bytes // max(N * row_bytes, 1))
    divs = [d for d in range(1, B + 1) if B % d == 0 and d <= max_bt] or [1]
    if B >= 2:
        multi = [d for d in divs if B // d >= 2]
        if multi:
            divs = multi
    return max(divs)


def efficient_additive_attention(x, params, token_dim, *,
                                 compute_dtype=jnp.bfloat16, bt=None):
    """x: [B, N, D_in] float32 -> [B, N, token_dim] float32."""
    B, N, Din = x.shape
    wq, bq, wk, bk, wg, wp, bp, wf, bf = params
    Dh = wq.shape[1]
    Dh_p = _round_up(Dh, 128)        # lane-dense hidden width
    Do_p = _round_up(token_dim, 128)  # lane-dense output width
    f32 = jnp.float32
    scale = token_dim ** (-0.5)

    # ---- pack + zero-pad weights (pre-pack once in a real model; zero pad
    # columns/rows leave L2 norms and matmul results exact).
    wqk = jnp.zeros((Din, 2 * Dh_p), f32)
    wqk = wqk.at[:, :Dh].set(wq).at[:, Dh_p:Dh_p + Dh].set(wk)
    bqk = jnp.zeros((1, 2 * Dh_p), f32)
    bqk = bqk.at[:, :Dh].set(bq.reshape(1, Dh)) \
             .at[:, Dh_p:Dh_p + Dh].set(bk.reshape(1, Dh))
    wg_row = jnp.zeros((1, Dh_p), f32).at[:, :Dh].set(wg.reshape(1, Dh) * scale)
    wp_p = jnp.zeros((Dh_p, Dh_p), f32).at[:Dh, :Dh].set(wp)
    bp_p = jnp.zeros((1, Dh_p), f32).at[:, :Dh].set(bp.reshape(1, Dh))
    wf_p = jnp.zeros((Dh_p, Do_p), f32).at[:Dh, :token_dim].set(wf)
    bf_p = jnp.zeros((1, Do_p), f32).at[:, :token_dim].set(bf.reshape(1, token_dim))

    # bf16 on the MXU (v6e/v7x fast path); biases / VPU / EUP math stay f32.
    mm = jnp.dtype(compute_dtype)
    x_mm = x.astype(mm)
    wqk = wqk.astype(mm)
    wp_p = wp_p.astype(mm)
    wf_p = wf_p.astype(mm)

    # ---- batch tile size + explicit VMEM budget
    # per-token bytes: double-buffered x + out tiles plus rough f32 temporaries
    row_bytes = 2 * (Din * mm.itemsize + Do_p * 4) + 8 * Dh_p * 4
    if bt is None:
        bt = _choose_bt(B, N, row_bytes)
    assert B % bt == 0
    grid = (B // bt,)
    # TODO(synk): for large N (>=512), add a second "arbitrary" grid axis over
    # token tiles with a two-pass G accumulation in VMEM scratch to bound
    # vreg/VMEM pressure; not needed at these shapes.

    w_bytes = ((wqk.size + wp_p.size + wf_p.size) * mm.itemsize
               + (bqk.size + wg_row.size + bp_p.size + bf_p.size) * 4)
    vmem_limit = int(min(32 << 20,
                         max(8 << 20, 2 * (w_bytes + bt * N * row_bytes))))

    out_shape = jax.ShapeDtypeStruct((B, N, Do_p), f32)
    x_spec = pl.BlockSpec((bt, N, Din), lambda b: (b, 0, 0))
    o_spec = pl.BlockSpec((bt, N, Do_p), lambda b: (b, 0, 0))

    def call(weight_pipeline_mode):
        def wspec(shape):
            if weight_pipeline_mode is None:
                return pl.BlockSpec(shape, lambda b: (0, 0))
            return pl.BlockSpec(shape, lambda b: (0, 0),
                                pipeline_mode=weight_pipeline_mode)

        return pl.pallas_call(
            _eaa_kernel,
            out_shape=out_shape,
            grid_spec=pltpu.PrefetchScalarGridSpec(
                num_scalar_prefetch=0,
                grid=grid,
                in_specs=[
                    x_spec,
                    wspec((Din, 2 * Dh_p)),   # fused wq|wk
                    wspec((1, 2 * Dh_p)),     # fused bq|bk
                    wspec((1, Dh_p)),         # w_g row (scale folded in)
                    wspec((Dh_p, Dh_p)),      # Proj weight
                    wspec((1, Dh_p)),         # Proj bias
                    wspec((Dh_p, Do_p)),      # final weight
                    wspec((1, Do_p)),         # final bias
                ],
                out_specs=o_spec,
            ),
            compiler_params=pltpu.CompilerParams(
                dimension_semantics=("parallel",),
                vmem_limit_bytes=vmem_limit),
        )(x_mm, wqk, bqk, wg_row, wp_p, bp_p, wf_p, bf_p)

    try:
        # Constant-index weight operands only need a single VMEM buffer.
        out_p = call(pl.Buffered(buffer_count=1))
    except Exception:
        # Fallback for JAX versions without BlockSpec.pipeline_mode support.
        out_p = call(None)

    # Drop the lane padding outside the kernel.
    return out_p[..., :token_dim]


def _reference(x, params, token_dim):
    """Pure-JAX reference mirroring the PyTorch forward."""
    wq, bq, wk, bk, wg, wp, bp, wf, bf = params
    q = x @ wq + bq
    k = x @ wk + bk
    q = q / jnp.maximum(jnp.linalg.norm(q, axis=-1, keepdims=True), EPS)
    k = k / jnp.maximum(jnp.linalg.norm(k, axis=-1, keepdims=True), EPS)
    qw = q @ wg.reshape(-1, 1)                       # [B, N, 1]
    A = qw * (token_dim ** -0.5)
    A = A / jnp.maximum(jnp.linalg.norm(A, axis=1, keepdims=True), EPS)
    G = jnp.sum(A * q, axis=1, keepdims=True)        # [B, 1, Dh]
    out = (G * k) @ wp + bp + q
    out = out @ wf + bf
    return out


def make_params(key, in_dims, token_dim, num_heads=1):
    Dh = token_dim * num_heads
    ks = jax.random.split(key, 9)
    s = 0.05
    wq = jax.random.normal(ks[0], (in_dims, Dh), jnp.float32) * s
    bq = jax.random.normal(ks[1], (1, Dh), jnp.float32) * s
    wk = jax.random.normal(ks[2], (in_dims, Dh), jnp.float32) * s
    bk = jax.random.normal(ks[3], (1, Dh), jnp.float32) * s
    wg = jax.random.normal(ks[4], (1, Dh), jnp.float32)          # w_g ~ randn
    wp = jax.random.normal(ks[5], (Dh, Dh), jnp.float32) * s
    bp = jax.random.normal(ks[6], (1, Dh), jnp.float32) * s
    wf = jax.random.normal(ks[7], (Dh, token_dim), jnp.float32) * s
    bf = jax.random.normal(ks[8], (1, token_dim), jnp.float32) * s
    return (wq, bq, wk, bk, wg, wp, bp, wf, bf)


if __name__ == "__main__":
    B, N, in_dims, token_dim = 2, 8, 32, 32
    key = jax.random.PRNGKey(0)
    kx, kp = jax.random.split(key)
    x = jax.random.normal(kx, (B, N, in_dims), jnp.float32)
    params = make_params(kp, in_dims, token_dim)

    ref = _reference(x, params, token_dim)

    # Default fast path: bf16 matmuls on the MXU, f32 normalization math.
    out_bf16 = jax.block_until_ready(
        efficient_additive_attention(x, params, token_dim))
    assert out_bf16.shape == (B, N, token_dim)
    err_bf16 = float(jnp.max(jnp.abs(out_bf16 - ref)))
    assert err_bf16 < 2e-2, f"bf16 path max err {err_bf16}"

    # f32 matmul path: tight semantics check against the reference.
    out_f32 = jax.block_until_ready(
        efficient_additive_attention(x, params, token_dim,
                                     compute_dtype=jnp.float32))
    assert out_f32.shape == (B, N, token_dim)
    assert jnp.allclose(out_f32, ref, atol=1e-5, rtol=1e-5), \
        f"f32 path max err {float(jnp.max(jnp.abs(out_f32 - ref)))}"

    print("KERNEL_OK")
</pallas_src>

<mosaic_0001>
module attributes {stable_mosaic.version = 11 : i64} {
  func.func @_eaa_kernel(%arg0: i32, %arg1: memref<1x8x32xbf16, #tpu.memory_space<vmem>>, %arg2: memref<32x256xbf16, #tpu.memory_space<vmem>>, %arg3: memref<1x256xf32, #tpu.memory_space<vmem>>, %arg4: memref<1x128xf32, #tpu.memory_space<vmem>>, %arg5: memref<128x128xbf16, #tpu.memory_space<vmem>>, %arg6: memref<1x128xf32, #tpu.memory_space<vmem>>, %arg7: memref<128x128xbf16, #tpu.memory_space<vmem>>, %arg8: memref<1x128xf32, #tpu.memory_space<vmem>>, %arg9: memref<1x8x128xf32, #tpu.memory_space<vmem>>) attributes {dimension_semantics = [#tpu.dimension_semantics<parallel>], iteration_bounds = array<i64: 2>, scalar_prefetch = 0 : i64, scratch_operands = 0 : i64, tpu.core_type = #tpu.core_type<tc>, window_params = [{transform_indices = @transform_0, window_bounds = array<i64: 1, 8, 32>}, {pipeline_mode = #tpu.pipeline_mode<synchronous>, transform_indices = @transform_1, window_bounds = array<i64: 32, 256>}, {pipeline_mode = #tpu.pipeline_mode<synchronous>, transform_indices = @transform_2, window_bounds = array<i64: 1, 256>}, {pipeline_mode = #tpu.pipeline_mode<synchronous>, transform_indices = @transform_3, window_bounds = array<i64: 1, 128>}, {pipeline_mode = #tpu.pipeline_mode<synchronous>, transform_indices = @transform_4, window_bounds = array<i64: 128, 128>}, {pipeline_mode = #tpu.pipeline_mode<synchronous>, transform_indices = @transform_5, window_bounds = array<i64: 1, 128>}, {pipeline_mode = #tpu.pipeline_mode<synchronous>, transform_indices = @transform_6, window_bounds = array<i64: 128, 128>}, {pipeline_mode = #tpu.pipeline_mode<synchronous>, transform_indices = @transform_7, window_bounds = array<i64: 1, 128>}, {transform_indices = @transform_8, window_bounds = array<i64: 1, 8, 128>}]} {
    %c0 = arith.constant 0 : index
    %c0_0 = arith.constant 0 : index
    %c0_1 = arith.constant 0 : index
    %0 = vector.load %arg1[%c0, %c0_0, %c0_1] : memref<1x8x32xbf16, #tpu.memory_space<vmem>>, vector<1x8x32xbf16>
    %1 = vector.shape_cast %0 : vector<1x8x32xbf16> to vector<8x32xbf16>
    %c0_2 = arith.constant 0 : index
    %c0_3 = arith.constant 0 : index
    %2 = vector.load %arg2[%c0_2, %c0_3] : memref<32x256xbf16, #tpu.memory_space<vmem>>, vector<32x256xbf16>
    %cst = arith.constant dense<0.000000e+00> : vector<8x256xf32>
    %3 = tpu.matmul %1, %2, %cst {dimension_numbers = #tpu.dot_dimension_numbers<[1], [0], [0], [1], [0, 0, 1, 1], [], []>} : vector<8x32xbf16>, vector<32x256xbf16>, vector<8x256xf32> -> vector<8x256xf32>
    %c0_4 = arith.constant 0 : index
    %c0_5 = arith.constant 0 : index
    %4 = vector.load %arg3[%c0_4, %c0_5] : memref<1x256xf32, #tpu.memory_space<vmem>>, vector<1x256xf32>
    %5 = vector.broadcast %4 : vector<1x256xf32> to vector<8x256xf32>
    %6 = arith.addf %3, %5 : vector<8x256xf32>
    %7 = vector.extract_strided_slice %6 {offsets = [0, 0], sizes = [8, 128], strides = [1, 1]} : vector<8x256xf32> to vector<8x128xf32>
    %8 = vector.extract_strided_slice %6 {offsets = [0, 128], sizes = [8, 128], strides = [1, 1]} : vector<8x256xf32> to vector<8x128xf32>
    %9 = arith.mulf %7, %7 : vector<8x128xf32>
    %cst_6 = arith.constant dense<0.000000e+00> : vector<8xf32>
    %10 = vector.multi_reduction <add>, %9, %cst_6 [1] : vector<8x128xf32> to vector<8xf32>
    %11 = vector.shape_cast %10 : vector<8xf32> to vector<8x1xf32>
    %cst_7 = arith.constant 1.000000e-24 : f32
    %12 = vector.broadcast %cst_7 : f32 to vector<8x1xf32>
    %13 = arith.maximumf %11, %12 : vector<8x1xf32>
    %14 = math.rsqrt %13 : vector<8x1xf32>
    %15 = vector.broadcast %14 : vector<8x1xf32> to vector<8x128xf32>
    %16 = arith.mulf %7, %15 : vector<8x128xf32>
    %17 = arith.mulf %8, %8 : vector<8x128xf32>
    %cst_8 = arith.constant dense<0.000000e+00> : vector<8xf32>
    %18 = vector.multi_reduction <add>, %17, %cst_8 [1] : vector<8x128xf32> to vector<8xf32>
    %19 = vector.shape_cast %18 : vector<8xf32> to vector<8x1xf32>
    %cst_9 = arith.constant 1.000000e-24 : f32
    %20 = vector.broadcast %cst_9 : f32 to vector<8x1xf32>
    %21 = arith.maximumf %19, %20 : vector<8x1xf32>
    %22 = math.rsqrt %21 : vector<8x1xf32>
    %23 = vector.broadcast %22 : vector<8x1xf32> to vector<8x128xf32>
    %24 = arith.mulf %8, %23 : vector<8x128xf32>
    %c0_10 = arith.constant 0 : index
    %c0_11 = arith.constant 0 : index
    %25 = vector.load %arg4[%c0_10, %c0_11] : memref<1x128xf32, #tpu.memory_space<vmem>>, vector<1x128xf32>
    %26 = vector.broadcast %25 : vector<1x128xf32> to vector<8x128xf32>
    %27 = arith.mulf %16, %26 : vector<8x128xf32>
    %cst_12 = arith.constant dense<0.000000e+00> : vector<8xf32>
    %28 = vector.multi_reduction <add>, %27, %cst_12 [1] : vector<8x128xf32> to vector<8xf32>
    %29 = vector.shape_cast %28 : vector<8xf32> to vector<8x1xf32>
    %30 = vector.shape_cast %29 : vector<8x1xf32> to vector<1x8x1xf32>
    %31 = arith.mulf %30, %30 : vector<1x8x1xf32>
    %cst_13 = arith.constant dense<0.000000e+00> : vector<1x1xf32>
    %32 = vector.multi_reduction <add>, %31, %cst_13 [1] : vector<1x8x1xf32> to vector<1x1xf32>
    %33 = vector.shape_cast %32 : vector<1x1xf32> to vector<1x1x1xf32>
    %cst_14 = arith.constant 1.000000e-24 : f32
    %34 = vector.broadcast %cst_14 : f32 to vector<1x1x1xf32>
    %35 = arith.maximumf %33, %34 : vector<1x1x1xf32>
    %36 = math.rsqrt %35 : vector<1x1x1xf32>
    %37 = vector.broadcast %36 : vector<1x1x1xf32> to vector<1x8x1xf32>
    %38 = arith.mulf %30, %37 : vector<1x8x1xf32>
    %39 = vector.shape_cast %16 : vector<8x128xf32> to vector<1x8x128xf32>
    %40 = vector.shape_cast %24 : vector<8x128xf32> to vector<1x8x128xf32>
    %41 = vector.broadcast %38 : vector<1x8x1xf32> to vector<1x8x128xf32>
    %42 = arith.mulf %41, %39 : vector<1x8x128xf32>
    %cst_15 = arith.constant dense<0.000000e+00> : vector<1x128xf32>
    %43 = vector.multi_reduction <add>, %42, %cst_15 [1] : vector<1x8x128xf32> to vector<1x128xf32>
    %44 = vector.shape_cast %43 : vector<1x128xf32> to vector<1x1x128xf32>
    %45 = vector.broadcast %44 : vector<1x1x128xf32> to vector<1x8x128xf32>
    %46 = arith.mulf %45, %40 : vector<1x8x128xf32>
    %47 = vector.shape_cast %46 : vector<1x8x128xf32> to vector<8x128xf32>
    %48 = arith.truncf %47 : vector<8x128xf32> to vector<8x128xbf16>
    %c0_16 = arith.constant 0 : index
    %c0_17 = arith.constant 0 : index
    %49 = vector.load %arg5[%c0_16, %c0_17] : memref<128x128xbf16, #tpu.memory_space<vmem>>, vector<128x128xbf16>
    %cst_18 = arith.constant dense<0.000000e+00> : vector<8x128xf32>
    %50 = tpu.matmul %48, %49, %cst_18 {dimension_numbers = #tpu.dot_dimension_numbers<[1], [0], [0], [1], [0, 0, 1, 1], [], []>} : vector<8x128xbf16>, vector<128x128xbf16>, vector<8x128xf32> -> vector<8x128xf32>
    %c0_19 = arith.constant 0 : index
    %c0_20 = arith.constant 0 : index
    %51 = vector.load %arg6[%c0_19, %c0_20] : memref<1x128xf32, #tpu.memory_space<vmem>>, vector<1x128xf32>
    %52 = vector.broadcast %51 : vector<1x128xf32> to vector<8x128xf32>
    %53 = arith.addf %50, %52 : vector<8x128xf32>
    %54 = arith.addf %53, %16 : vector<8x128xf32>
    %55 = arith.truncf %54 : vector<8x128xf32> to vector<8x128xbf16>
    %c0_21 = arith.constant 0 : index
    %c0_22 = arith.constant 0 : index
    %56 = vector.load %arg7[%c0_21, %c0_22] : memref<128x128xbf16, #tpu.memory_space<vmem>>, vector<128x128xbf16>
    %cst_23 = arith.constant dense<0.000000e+00> : vector<8x128xf32>
    %57 = tpu.matmul %55, %56, %cst_23 {dimension_numbers = #tpu.dot_dimension_numbers<[1], [0], [0], [1], [0, 0, 1, 1], [], []>} : vector<8x128xbf16>, vector<128x128xbf16>, vector<8x128xf32> -> vector<8x128xf32>
    %c0_24 = arith.constant 0 : index
    %c0_25 = arith.constant 0 : index
    %58 = vector.load %arg8[%c0_24, %c0_25] : memref<1x128xf32, #tpu.memory_space<vmem>>, vector<1x128xf32>
    %59 = vector.broadcast %58 : vector<1x128xf32> to vector<8x128xf32>
    %60 = arith.addf %57, %59 : vector<8x128xf32>
    %61 = vector.shape_cast %60 : vector<8x128xf32> to vector<1x8x128xf32>
    %c0_26 = arith.constant 0 : index
    %c0_27 = arith.constant 0 : index
    %c0_28 = arith.constant 0 : index
    %62 = vector.load %arg9[%c0_26, %c0_27, %c0_28] : memref<1x8x128xf32, #tpu.memory_space<vmem>>, vector<1x8x128xf32>
    tpu.vector_store %arg9[%c0_26, %c0_27, %c0_28], %61 {strides = array<i32>} : memref<1x8x128xf32, #tpu.memory_space<vmem>>, vector<1x8x128xf32>,
    return
  }
  func.func @transform_0(%arg0: i32) -> (i32, i32, i32) {
    %c0_i32 = arith.constant 0 : i32
    %c0_i32_0 = arith.constant 0 : i32
    %c0_i32_1 = arith.constant 0 : i32
    return %arg0, %c0_i32, %c0_i32_0 : i32, i32, i32
  }
  func.func @transform_1(%arg0: i32) -> (i32, i32) {
    %c0_i32 = arith.constant 0 : i32
    %c0_i32_0 = arith.constant 0 : i32
    %c0_i32_1 = arith.constant 0 : i32
    return %c0_i32, %c0_i32_0 : i32, i32
  }
  func.func @transform_2(%arg0: i32) -> (i32, i32) {
    %c0_i32 = arith.constant 0 : i32
    %c0_i32_0 = arith.constant 0 : i32
    %c0_i32_1 = arith.constant 0 : i32
    return %c0_i32, %c0_i32_0 : i32, i32
  }
  func.func @transform_3(%arg0: i32) -> (i32, i32) {
    %c0_i32 = arith.constant 0 : i32
    %c0_i32_0 = arith.constant 0 : i32
    %c0_i32_1 = arith.constant 0 : i32
    return %c0_i32, %c0_i32_0 : i32, i32
  }
  func.func @transform_4(%arg0: i32) -> (i32, i32) {
    %c0_i32 = arith.constant 0 : i32
    %c0_i32_0 = arith.constant 0 : i32
    %c0_i32_1 = arith.constant 0 : i32
    return %c0_i32, %c0_i32_0 : i32, i32
  }
  func.func @transform_5(%arg0: i32) -> (i32, i32) {
    %c0_i32 = arith.constant 0 : i32
    %c0_i32_0 = arith.constant 0 : i32
    %c0_i32_1 = arith.constant 0 : i32
    return %c0_i32, %c0_i32_0 : i32, i32
  }
  func.func @transform_6(%arg0: i32) -> (i32, i32) {
    %c0_i32 = arith.constant 0 : i32
    %c0_i32_0 = arith.constant 0 : i32
    %c0_i32_1 = arith.constant 0 : i32
    return %c0_i32, %c0_i32_0 : i32, i32
  }
  func.func @transform_7(%arg0: i32) -> (i32, i32) {
    %c0_i32 = arith.constant 0 : i32
    %c0_i32_0 = arith.constant 0 : i32
    %c0_i32_1 = arith.constant 0 : i32
    return %c0_i32, %c0_i32_0 : i32, i32
  }
  func.func @transform_8(%arg0: i32) -> (i32, i32, i32) {
    %c0_i32 = arith.constant 0 : i32
    %c0_i32_0 = arith.constant 0 : i32
    %c0_i32_1 = arith.constant 0 : i32
    return %arg0, %c0_i32, %c0_i32_0 : i32, i32, i32
  }
}

module attributes {stable_mosaic.version = 11 : i64} {
  func.func @_eaa_kernel(%arg0: i32, %arg1: memref<1x8x32xbf16, #tpu.memory_space<vmem>>, %arg2: memref<32x256xbf16, #tpu.memory_space<vmem>>, %arg3: memref<1x256xf32, #tpu.memory_space<vmem>>, %arg4: memref<1x128xf32, #tpu.memory_space<vmem>>, %arg5: memref<128x128xbf16, #tpu.memory_space<vmem>>, %arg6: memref<1x128xf32, #tpu.memory_space<vmem>>, %arg7: memref<128x128xbf16, #tpu.memory_space<vmem>>, %arg8: memref<1x128xf32, #tpu.memory_space<vmem>>, %arg9: memref<1x8x128xf32, #tpu.memory_space<vmem>>) attributes {dimension_semantics = [#tpu.dimension_semantics<parallel>], iteration_bounds = array<i64: 2>, scalar_prefetch = 0 : i64, scratch_operands = 0 : i64, tpu.core_type = #tpu.core_type<tc>, window_params = [{transform_indices = @transform_0, window_bounds = array<i64: 1, 8, 32>}, {pipeline_mode = #tpu.pipeline_mode<synchronous>, transform_indices = @transform_1, window_bounds = array<i64: 32, 256>}, {pipeline_mode = #tpu.pipeline_mode<synchronous>, transform_indices = @transform_2, window_bounds = array<i64: 1, 256>}, {pipeline_mode = #tpu.pipeline_mode<synchronous>, transform_indices = @transform_3, window_bounds = array<i64: 1, 128>}, {pipeline_mode = #tpu.pipeline_mode<synchronous>, transform_indices = @transform_4, window_bounds = array<i64: 128, 128>}, {pipeline_mode = #tpu.pipeline_mode<synchronous>, transform_indices = @transform_5, window_bounds = array<i64: 1, 128>}, {pipeline_mode = #tpu.pipeline_mode<synchronous>, transform_indices = @transform_6, window_bounds = array<i64: 128, 128>}, {pipeline_mode = #tpu.pipeline_mode<synchronous>, transform_indices = @transform_7, window_bounds = array<i64: 1, 128>}, {transform_indices = @transform_8, window_bounds = array<i64: 1, 8, 128>}]} {
    %c0 = arith.constant 0 : index
    %c0_0 = arith.constant 0 : index
    %c0_1 = arith.constant 0 : index
    %0 = vector.load %arg1[%c0, %c0_0, %c0_1] : memref<1x8x32xbf16, #tpu.memory_space<vmem>>, vector<1x8x32xbf16>
    %1 = vector.shape_cast %0 : vector<1x8x32xbf16> to vector<8x32xbf16>
    %c0_2 = arith.constant 0 : index
    %c0_3 = arith.constant 0 : index
    %2 = vector.load %arg2[%c0_2, %c0_3] : memref<32x256xbf16, #tpu.memory_space<vmem>>, vector<32x256xbf16>
    %cst = arith.constant dense<0.000000e+00> : vector<8x256xf32>
    %3 = tpu.matmul %1, %2, %cst {dimension_numbers = #tpu.dot_dimension_numbers<[1], [0], [0], [1], [0, 0, 1, 1], [], []>} : vector<8x32xbf16>, vector<32x256xbf16>, vector<8x256xf32> -> vector<8x256xf32>
    %c0_4 = arith.constant 0 : index
    %c0_5 = arith.constant 0 : index
    %4 = vector.load %arg3[%c0_4, %c0_5] : memref<1x256xf32, #tpu.memory_space<vmem>>, vector<1x256xf32>
    %5 = vector.broadcast %4 : vector<1x256xf32> to vector<8x256xf32>
    %6 = arith.addf %3, %5 : vector<8x256xf32>
    %7 = vector.extract_strided_slice %6 {offsets = [0, 0], sizes = [8, 128], strides = [1, 1]} : vector<8x256xf32> to vector<8x128xf32>
    %8 = vector.extract_strided_slice %6 {offsets = [0, 128], sizes = [8, 128], strides = [1, 1]} : vector<8x256xf32> to vector<8x128xf32>
    %9 = arith.mulf %7, %7 : vector<8x128xf32>
    %cst_6 = arith.constant dense<0.000000e+00> : vector<8xf32>
    %10 = vector.multi_reduction <add>, %9, %cst_6 [1] : vector<8x128xf32> to vector<8xf32>
    %11 = vector.shape_cast %10 : vector<8xf32> to vector<8x1xf32>
    %cst_7 = arith.constant 1.000000e-24 : f32
    %12 = vector.broadcast %cst_7 : f32 to vector<8x1xf32>
    %13 = arith.maximumf %11, %12 : vector<8x1xf32>
    %14 = math.rsqrt %13 : vector<8x1xf32>
    %15 = vector.broadcast %14 : vector<8x1xf32> to vector<8x128xf32>
    %16 = arith.mulf %7, %15 : vector<8x128xf32>
    %17 = arith.mulf %8, %8 : vector<8x128xf32>
    %cst_8 = arith.constant dense<0.000000e+00> : vector<8xf32>
    %18 = vector.multi_reduction <add>, %17, %cst_8 [1] : vector<8x128xf32> to vector<8xf32>
    %19 = vector.shape_cast %18 : vector<8xf32> to vector<8x1xf32>
    %cst_9 = arith.constant 1.000000e-24 : f32
    %20 = vector.broadcast %cst_9 : f32 to vector<8x1xf32>
    %21 = arith.maximumf %19, %20 : vector<8x1xf32>
    %22 = math.rsqrt %21 : vector<8x1xf32>
    %23 = vector.broadcast %22 : vector<8x1xf32> to vector<8x128xf32>
    %24 = arith.mulf %8, %23 : vector<8x128xf32>
    %c0_10 = arith.constant 0 : index
    %c0_11 = arith.constant 0 : index
    %25 = vector.load %arg4[%c0_10, %c0_11] : memref<1x128xf32, #tpu.memory_space<vmem>>, vector<1x128xf32>
    %26 = vector.broadcast %25 : vector<1x128xf32> to vector<8x128xf32>
    %27 = arith.mulf %16, %26 : vector<8x128xf32>
    %cst_12 = arith.constant dense<0.000000e+00> : vector<8xf32>
    %28 = vector.multi_reduction <add>, %27, %cst_12 [1] : vector<8x128xf32> to vector<8xf32>
    %29 = vector.shape_cast %28 : vector<8xf32> to vector<8x1xf32>
    %30 = vector.shape_cast %29 : vector<8x1xf32> to vector<1x8x1xf32>
    %31 = arith.mulf %30, %30 : vector<1x8x1xf32>
    %cst_13 = arith.constant dense<0.000000e+00> : vector<1x1xf32>
    %32 = vector.multi_reduction <add>, %31, %cst_13 [1] : vector<1x8x1xf32> to vector<1x1xf32>
    %33 = vector.shape_cast %32 : vector<1x1xf32> to vector<1x1x1xf32>
    %cst_14 = arith.constant 1.000000e-24 : f32
    %34 = vector.broadcast %cst_14 : f32 to vector<1x1x1xf32>
    %35 = arith.maximumf %33, %34 : vector<1x1x1xf32>
    %36 = math.rsqrt %35 : vector<1x1x1xf32>
    %37 = vector.broadcast %36 : vector<1x1x1xf32> to vector<1x8x1xf32>
    %38 = arith.mulf %30, %37 : vector<1x8x1xf32>
    %39 = vector.shape_cast %16 : vector<8x128xf32> to vector<1x8x128xf32>
    %40 = vector.shape_cast %24 : vector<8x128xf32> to vector<1x8x128xf32>
    %41 = vector.broadcast %38 : vector<1x8x1xf32> to vector<1x8x128xf32>
    %42 = arith.mulf %41, %39 : vector<1x8x128xf32>
    %cst_15 = arith.constant dense<0.000000e+00> : vector<1x128xf32>
    %43 = vector.multi_reduction <add>, %42, %cst_15 [1] : vector<1x8x128xf32> to vector<1x128xf32>
    %44 = vector.shape_cast %43 : vector<1x128xf32> to vector<1x1x128xf32>
    %45 = vector.broadcast %44 : vector<1x1x128xf32> to vector<1x8x128xf32>
    %46 = arith.mulf %45, %40 : vector<1x8x128xf32>
    %47 = vector.shape_cast %46 : vector<1x8x128xf32> to vector<8x128xf32>
    %48 = arith.truncf %47 : vector<8x128xf32> to vector<8x128xbf16>
    %c0_16 = arith.constant 0 : index
    %c0_17 = arith.constant 0 : index
    %49 = vector.load %arg5[%c0_16, %c0_17] : memref<128x128xbf16, #tpu.memory_space<vmem>>, vector<128x128xbf16>
    %cst_18 = arith.constant dense<0.000000e+00> : vector<8x128xf32>
    %50 = tpu.matmul %48, %49, %cst_18 {dimension_numbers = #tpu.dot_dimension_numbers<[1], [0], [0], [1], [0, 0, 1, 1], [], []>} : vector<8x128xbf16>, vector<128x128xbf16>, vector<8x128xf32> -> vector<8x128xf32>
    %c0_19 = arith.constant 0 : index
    %c0_20 = arith.constant 0 : index
    %51 = vector.load %arg6[%c0_19, %c0_20] : memref<1x128xf32, #tpu.memory_space<vmem>>, vector<1x128xf32>
    %52 = vector.broadcast %51 : vector<1x128xf32> to vector<8x128xf32>
    %53 = arith.addf %50, %52 : vector<8x128xf32>
    %54 = arith.addf %53, %16 : vector<8x128xf32>
    %55 = arith.truncf %54 : vector<8x128xf32> to vector<8x128xbf16>
    %c0_21 = arith.constant 0 : index
    %c0_22 = arith.constant 0 : index
    %56 = vector.load %arg7[%c0_21, %c0_22] : memref<128x128xbf16, #tpu.memory_space<vmem>>, vector<128x128xbf16>
    %cst_23 = arith.constant dense<0.000000e+00> : vector<8x128xf32>
    %57 = tpu.matmul %55, %56, %cst_23 {dimension_numbers = #tpu.dot_dimension_numbers<[1], [0], [0], [1], [0, 0, 1, 1], [], []>} : vector<8x128xbf16>, vector<128x128xbf16>, vector<8x128xf32> -> vector<8x128xf32>
    %c0_24 = arith.constant 0 : index
    %c0_25 = arith.constant 0 : index
    %58 = vector.load %arg8[%c0_24, %c0_25] : memref<1x128xf32, #tpu.memory_space<vmem>>, vector<1x128xf32>
    %59 = vector.broadcast %58 : vector<1x128xf32> to vector<8x128xf32>
    %60 = arith.addf %57, %59 : vector<8x128xf32>
    %61 = vector.shape_cast %60 : vector<8x128xf32> to vector<1x8x128xf32>
    %c0_26 = arith.constant 0 : index
    %c0_27 = arith.constant 0 : index
    %c0_28 = arith.constant 0 : index
    %62 = vector.load %arg9[%c0_26, %c0_27, %c0_28] : memref<1x8x128xf32, #tpu.memory_space<vmem>>, vector<1x8x128xf32>
    tpu.vector_store %arg9[%c0_26, %c0_27, %c0_28], %61 {strides = array<i32>} : memref<1x8x128xf32, #tpu.memory_space<vmem>>, vector<1x8x128xf32>,
    return
  }
  func.func @transform_0(%arg0: i32) -> (i32, i32, i32) {
    %c0_i32 = arith.constant 0 : i32
    %c0_i32_0 = arith.constant 0 : i32
    %c0_i32_1 = arith.constant 0 : i32
    return %arg0, %c0_i32, %c0_i32_0 : i32, i32, i32
  }
  func.func @transform_1(%arg0: i32) -> (i32, i32) {
    %c0_i32 = arith.constant 0 : i32
    %c0_i32_0 = arith.constant 0 : i32
    %c0_i32_1 = arith.constant 0 : i32
    return %c0_i32, %c0_i32_0 : i32, i32
  }
  func.func @transform_2(%arg0: i32) -> (i32, i32) {
    %c0_i32 = arith.constant 0 : i32
    %c0_i32_0 = arith.constant 0 : i32
    %c0_i32_1 = arith.constant 0 : i32
    return %c0_i32, %c0_i32_0 : i32, i32
  }
  func.func @transform_3(%arg0: i32) -> (i32, i32) {
    %c0_i32 = arith.constant 0 : i32
    %c0_i32_0 = arith.constant 0 : i32
    %c0_i32_1 = arith.constant 0 : i32
    return %c0_i32, %c0_i32_0 : i32, i32
  }
  func.func @transform_4(%arg0: i32) -> (i32, i32) {
    %c0_i32 = arith.constant 0 : i32
    %c0_i32_0 = arith.constant 0 : i32
    %c0_i32_1 = arith.constant 0 : i32
    return %c0_i32, %c0_i32_0 : i32, i32
  }
  func.func @transform_5(%arg0: i32) -> (i32, i32) {
    %c0_i32 = arith.constant 0 : i32
    %c0_i32_0 = arith.constant 0 : i32
    %c0_i32_1 = arith.constant 0 : i32
    return %c0_i32, %c0_i32_0 : i32, i32
  }
  func.func @transform_6(%arg0: i32) -> (i32, i32) {
    %c0_i32 = arith.constant 0 : i32
    %c0_i32_0 = arith.constant 0 : i32
    %c0_i32_1 = arith.constant 0 : i32
    return %c0_i32, %c0_i32_0 : i32, i32
  }
  func.func @transform_7(%arg0: i32) -> (i32, i32) {
    %c0_i32 = arith.constant 0 : i32
    %c0_i32_0 = arith.constant 0 : i32
    %c0_i32_1 = arith.constant 0 : i32
    return %c0_i32, %c0_i32_0 : i32, i32
  }
  func.func @transform_8(%arg0: i32) -> (i32, i32, i32) {
    %c0_i32 = arith.constant 0 : i32
    %c0_i32_0 = arith.constant 0 : i32
    %c0_i32_1 = arith.constant 0 : i32
    return %arg0, %c0_i32, %c0_i32_0 : i32, i32, i32
  }
}

</mosaic_0001>

<bundles_post_ra>
// kernel: tpu_custom_call.1
= control target key start
LH: loop header
LB: loop body
LE: loop exit
PB: predicated region body
PF: predicated region fallthrough
CT: control target
= control target key end

     0   :  { %s1491_s0 = inlined_call_operand.hbm [shape: bf16[2,8,32], index: 0, kind: input, shape index: {}]   ;;  %s1492_s1 = inlined_call_operand.hbm [shape: bf16[32,256], index: 1, kind: input, shape index: {}]   ;;  %s1493_s2 = inlined_call_operand.hbm [shape: f32[1,256], index: 2, kind: input, shape index: {}]   ;;  %s1494_s3 = inlined_call_operand.vmem [shape: f32[1,128], index: 3, kind: input, shape index: {}]   ;;  %s1495_s4 = inlined_call_operand.hbm [shape: bf16[128,128], index: 4, kind: input, shape index: {}]   ;;  %s1496_s5 = inlined_call_operand.vmem [shape: f32[1,128], index: 5, kind: input, shape index: {}]   ;;  %s1497_s6 = inlined_call_operand.hbm [shape: bf16[128,128], index: 6, kind: input, shape index: {}]   ;;  %s1498_s7 = inlined_call_operand.vmem [shape: f32[1,128], index: 7, kind: input, shape index: {}]   ;;  %s1499_s8 = inlined_call_operand.hbm [shape: f32[2,8,128], index: 8, kind: output, shape index: {}]  }
   0x1   :  { %1500 = sst [smem:[#allocation16_spill]] %s1492_s1 }
   0x2   :  { %1501 = sst [smem:[#allocation17_spill]] %s1493_s2 }
   0x3   :  { %1502 = sst [smem:[#allocation18_spill]] %s1495_s4 }
   0x4   :  { %13 = vsyncpa [#allocation3], 0 }
   0x5   :  { %15 = vsyncpa [#allocation3 + $0x1], 0 }
   0x6   :  { %16 = vsyncpa [#allocation6], 0 }
   0x7   :  { %17 = vsyncpa [#allocation9], 0 }
   0x8   :  { %18 = vsyncpa [#allocation4], 0 }
   0x9   :  { %20 = vsyncpa [#allocation4 + $0x1], 0  ;;  %s1304_s27 = smov 0   ;;  %s1306_s28 = smov 0  }
   0xa   :  { %s1308_s29 = smov 0   ;;  %s1310_s30 = smov 0  }
   0xb LB: > { %s1503_s1 = sld [smem:[#allocation16_spill]]  ;;  %s1328_s12 = sadd.s32 4294967295, %s1249_s30   ;;  %s1249_s30 = sphi %s1310_s30, %s1517_s30   ;;  %s1245_s29 = sphi %s1308_s29, %s1516_s29   ;;  %s1241_s28 = sphi %s1306_s28, %s1515_s28   ;;  %s1237_s27 = sphi %s1304_s27, %s1514_s27  }
   0xc   : > { %p804_p0 = scmp.ge.s32.totalorder %s1249_s30, 1  ;;  %p47_p1 = scmp.eq.s32.totalorder %s1328_s12, 0 }
   0xd   : > { %p230_p2 = scmp.lt.s32.totalorder %s1249_s30, 3  ;;  %s1251_s14 = smov [#allocation5]  }
   0xe   : > { %s243_s15 = sshll.u32 %s1251_s14, 4  ;;  %s1505_s4 = sld [smem:[#allocation18_spill]]  ;;  %s244_s15 = int_to_ptr.vmem [resolvable:$true] %s243_s15 }
   0xf   : > { %p1333_p3 = pnand %p804_p0, %p230_p2  ;;  %s1252_s20 = smov [#allocation8]  }
  0x10   : > { %s272_s21 = sshll.u32 %s1252_s20, 4  ;;  %s1253_s22 = smov 128   ;;  %s273_s21 = int_to_ptr.vmem [resolvable:$true] %s272_s21 }
  0x11   : > { %s241_s11 = sshll.u32 %s1503_s1, 4  ;;  %p945_p4 = pneg %p1333_p3  ;;  %s242_s11 = int_to_ptr.hbm [resolvable:$true] %s241_s11 }
  0x12   : > { %s1254_s23 = smov 8   ;;  %s1255_s24 = smov 64  }
  0x13   : > { %p1345_p6 = pnand %p945_p4, %p47_p1  ;;  %s1256_s25 = smov 4  }
  0x14   : > { %s270_s18 = sshll.u32 %s1505_s4, 4  ;;  %s1507_s2 = sld [smem:[#allocation17_spill]]  ;;  %s271_s18 = int_to_ptr.hbm [resolvable:$true] %s270_s18 }
  0x15   : > { %948 = dma.hbm_to_vmem [thread:$0]  (!%p1345_p6), %s242_s11, 512, %s244_s15, [#allocation6], %s1253_s22, %s1253_s22, %s1254_s23  }
  0x16   : > { %954 = dma.hbm_to_vmem [thread:$0]  (!%p1345_p6), %s271_s18, 1024, %s273_s21, [#allocation9], %s1255_s24, %s1255_s24, %s1256_s25  }
  0x17   : > { %s1257_s14 = smov [#allocation7]   ;;  %s287_s17 = sshll.u32 %s1497_s6, 4  ;;  %s288_s17 = int_to_ptr.hbm [resolvable:$true] %s287_s17 }
  0x18   : > { %s258_s11 = sshll.u32 %s1257_s14, 4  ;;  %s1258_s18 = smov [#allocation10]   ;;  %s259_s11 = int_to_ptr.vmem [resolvable:$true] %s258_s11 }
  0x19   : > { %s289_s20 = sshll.u32 %s1258_s18, 4  ;;  %s803_s21 = sadd.s32 4294967294, %s1249_s30   ;;  %s290_s20 = int_to_ptr.vmem [resolvable:$true] %s289_s20 }
  0x1a   : > { %s256_s10 = sshll.u32 %s1507_s2, 4  ;;  %s1365_s22 = sadd.s32 1, %s1249_s30   ;;  %s257_s10 = int_to_ptr.hbm [resolvable:$true] %s256_s10 }
  0x1b   : > { %951 = dma.hbm_to_vmem [thread:$0]  (!%p1345_p6), %s257_s10, 32, %s259_s11, [#allocation6]  }
  0x1c   : > { %957 = dma.hbm_to_vmem [thread:$0]  (!%p1345_p6), %s288_s17, 1024, %s290_s20, [#allocation9], %s1255_s24, %s1255_s24, %s1256_s25  }
  0x1d   : > { %s30_s23 = ssub.s32 %s1249_s30, %s1365_s22  ;;  %s33_s26 = sadd.s32 1, %s1245_s29 }
  0x1e   : > { %p31_p7 = scmp.eq.s32.totalorder %s30_s23, 0  ;;  %p40_p8 = scmp.ne.s32.totalorder %s1245_s29, %s1241_s28 }
  0x1f   : > { %p41_p9 = scmp.eq.s32.totalorder %s1249_s30, 0  ;;  %p46_p10 = scmp.ne.s32.totalorder %s1241_s28, %s1237_s27 }
  0x20   : > { %s1376_s9 = scalar_select %p31_p7, %s1245_s29, %s33_s26  }
  0x21   : > { %p1378_p11 = por %p41_p9, %p40_p8  ;;  %p1384_p12 = por %p47_p1, %p46_p10 }
  0x22   : > { %p217_p13 = scmp.eq.s32.totalorder %s1328_s12, 1  ;;  %p223_p0 = scmp.eq.s32.totalorder %s803_s21, 1 }
  0x23   : > { %p970_p2 = scmp.lt.s32.totalorder %s1249_s30, 2  ;;  %s306_s24 = sand.u32 1, %s1245_s29  }
  0x24   : > { %p1391_p4 = por %p217_p13, %p40_p8  ;;  %p1395_p6 = por %p223_p0, %p46_p10 }
  0x25   : > { %s810_s11 = sshll.u32 %s306_s24, 2  ;;  %s811_s15 = sshll.u32 %s1249_s30, 2 }
  0x26   : > { %s314_s18 = scalar_lea.hbm %s1491_s0, %s811_s15  ;;  %s310_s20 = scalar_lea.vmem [#allocation2], %s810_s11 }
  0x27   : > { %s318_s23 = sshll.u32 %s310_s20, 4  ;;  %s316_s26 = sshll.u32 %s314_s18, 4  ;;  %s319_s23 = int_to_ptr.vmem [resolvable:$true] %s318_s23  ;;  %s317_s26 = int_to_ptr.hbm [resolvable:$true] %s316_s26 }
  0x28   : > { %p1405_p7 = pnand %p970_p2, %p1378_p11  ;;  %s307_s1 = scalar_lea.sflag [#allocation3], %s306_s24 }
  0x29   : > { %s1145_s2 = sshra.s32 %s317_s26, 4  ;;  %s1152_s16 = scalar_lea.hbm %s1491_s0, 8  ;;  %s1146_s2 = int_to_ptr.hbm [resolvable:$true] %s1145_s2 }
  0x2a   : > { %s1147_s4 = scalar_lea.hbm %s1146_s2, 4  ;;  %p1149_p9 = pneg %p1405_p7 }
  0x2b   : > { %p1148_p8 = scmp.ne.s32.totalorder %s1146_s2, %s1147_s4  ;;  %p1153_p11 = scmp.lt.s32.totalorder %s1146_s2, %s1491_s0 }
  0x2c   : > { %p1154_p0 = scmp.lt.s32.totalorder %s1152_s16, %s1147_s4 }
  0x2d   : > { %p1150_p10 = pnand %p1149_p9, %p1148_p8 }
  0x2e   : > { %p1155_p2 = por %p1154_p0, %p1153_p11 }
  0x2f   : > { %p1151_p13 = pneg %p1150_p10 }
  0x31   : > { %p1156_p5 = pnand %p1155_p2, %p1151_p13 }
  0x33   : > { %1159 = shalt.err (!%p1156_p5)
}
  0x34   : > { %961 = dma.hbm_to_vmem [thread:$0]  (!%p1405_p7), %s317_s26, 64, %s319_s23, %s307_s1  }
  0x35   : > { %327 = sbr.rel (%p1333_p3) target bundleno = 791 (0x317), region = 52  ;;  %s1422_s24 = sand.u32 (!%p1333_p3), 1, %s1241_s28  }
  0x36   : > { %s813_s18 = sshll.u32 (!%p1333_p3), %s1422_s24, 2  ;;  %s330_s20 = scalar_lea.sflag (!%p1333_p3), [#allocation3], %s1422_s24 }
  0x37   : > { %s333_s11 = scalar_lea.vmem (!%p1333_p3), [#allocation2], %s813_s18 }
  0x3a   : > { %1220 = dma.done.wait (%p1384_p12), %s330_s20, 64  }
  0x3b   : > { %1222 = vsyncadd (%p1384_p12), %s330_s20, 4294967232 }
  0x3c   : > { %1224 = dma.done.wait (%p47_p1), [#allocation6], 544  }
  0x3d   : > { %1226 = vsyncadd (%p47_p1), [#allocation6], 4294966752 }
  0x3e   : > { %1228 = dma.done.wait (%p47_p1), [#allocation9], 2048  }
  0x3f   : > { %1230 = vsyncadd (%p47_p1), [#allocation9], 4294965248  ;;  %v829_v0 = vld [vmem:[#allocation5 + $0x10] sm:$0xf]  ;;  %v908_v1 = vld [vmem:[#allocation5 + $0x14] sm:$0xf0] }
  0x40   : > { %v821_v2 = vld [vmem:[#allocation5] sm:$0xf]  ;;  %v830_v3 = vor.u32 %v908_v1, %v829_v0  ;;  %v906_v4 = vld [vmem:[#allocation5 + $0x4] sm:$0xf0]  ;;  %v907_v5 = vld [vmem:[#allocation5 + $0x14] sm:$0xf] }
  0x41   : > { %v831_v6 = vld [vmem:[#allocation5 + $0x18] sm:$0xf0]  ;;  %v905_v7 = vld [vmem:[#allocation5 + $0x4] sm:$0xf]  ;;  %v823_v8 = vld [vmem:[#allocation5 + $0x8] sm:$0xf0]  ;;  %v822_v9 = vor.u32 %v906_v4, %v821_v2 }
  0x42   : > { %429 = vmatpush.bf16.msra.mxu0 %v830_v3  ;;  %v834_v10 = vor.u32 %v907_v5, %v831_v6  ;;  %v826_v11 = vor.u32 %v905_v7, %v823_v8  ;;  %v388_v12 = vld [vmem:[%s333_s11] sm:$0xf]  ;;  %vm419_vm0 = vcmask 261120   ;;  %v393_v13 = vld [vmem:[#allocation7] sm:$0x3]  ;;  %v914_v38 = vld [vmem:[#allocation8 + $0x28] sm:$0xff] }
  0x43   : > { %v395_v14 = vperm.slane %v393_v13, 0  ;;  %v396_v15 = vperm.slane %v393_v13, 1  ;;  %v1016_v32 = vld [vmem:[%s1494_s3] ss:$0 sm:$0xff]  ;;  %v916_v36 = vld [vmem:[#allocation8 + $0x38] sm:$0xff]  ;;  %v913_v41 = vld [vmem:[#allocation8 + $0x20] sm:$0xff] }
  0x44   : > { %442 = vmatpush.bf16.msra.mxu1 %v834_v10  ;;  %582 = vmatpush.bf16.msra.mxu2 %v916_v36  ;;  %v915_v37 = vld [vmem:[#allocation8 + $0x30] sm:$0xff]  ;;  %v912_v44 = vld [vmem:[#allocation8 + $0x18] sm:$0xff]  ;;  %v910_v51 = vld [vmem:[#allocation8 + $0x8] sm:$0xff]  ;;  %s902_s19 = sshll.u32 %s1328_s12, 3  ;;  %s818_s23 = sshll.u32 %s1422_s24, 3 }
  0x45   : > { %v911_v48 = vld [vmem:[#allocation8 + $0x10] sm:$0xff]  ;;  %v909_v54 = vld [vmem:[#allocation8] sm:$0xff]  ;;  %v924_v57 = vld [vmem:[#allocation10 + $0x38] sm:$0xff]  ;;  %s690_s15 = scalar_lea.hbm %s1499_s8, %s902_s19  ;;  %s386_s10 = scalar_lea.vmem [#allocation11], %s818_s23 }
  0x46   : > { %430 = vmatpush.bf16.msra.mxu0 %v822_v9  ;;  %665 = vmatpush.bf16.msra.mxu3 %v924_v57  ;;  %v923_v59 = vld [vmem:[#allocation10 + $0x30] sm:$0xff]  ;;  %v922_v63 = vld [vmem:[#allocation10 + $0x28] sm:$0xff]  ;;  %v921_v3 = vld [vmem:[#allocation10 + $0x20] sm:$0xff]  ;;  %s692_s18 = sshll.u32 %s386_s10, 4  ;;  %s694_s20 = sshll.u32 %s690_s15, 4  ;;  %s693_s18 = int_to_ptr.vmem [resolvable:$true] %s692_s18  ;;  %s695_s20 = int_to_ptr.hbm [resolvable:$true] %s694_s20 }
  0x47   : > { %v920_v8 = vld [vmem:[#allocation10 + $0x18] sm:$0xff]  ;;  %s680_s11 = scalar_lea.sflag [#allocation4], %s1422_s24  ;;  %s1189_s12 = sshra.s32 %s695_s20, 4  ;;  %s1190_s12 = int_to_ptr.hbm [resolvable:$true] %s1189_s12 }
  0x48   : > { %443 = vmatpush.bf16.msra.mxu1 %v826_v11  ;;  %583 = vmatpush.bf16.msra.mxu2 %v915_v37  ;;  %s1191_s1 = scalar_lea.hbm %s1190_s12, 8  ;;  %s1195_s13 = scalar_lea.hbm %s1499_s8, 16 }
  0x49   : > { %835 = vmatmul.msk.bf16.vlgmr.msra.gmra.mxu0 %vm419_vm0, %v388_v12  ;;  %p1192_p1 = scmp.ne.s32.totalorder %s1190_s12, %s1191_s1  ;;  %p1196_p12 = scmp.lt.s32.totalorder %s1190_s12, %s1499_s8 }
  0x4a   : > { %666 = vmatpush.bf16.msra.mxu3 %v923_v59  ;;  %p1197_p7 = scmp.lt.s32.totalorder %s1195_s13, %s1191_s1 }
  0x4b   : > { %836 = vmatmul.msk.bf16.vlgmr.msra.gmra.mxu1 %vm419_vm0, %v388_v12  ;;  %v919_v12 = vld [vmem:[#allocation10 + $0x10] sm:$0xff]  ;;  %p1193_p3 = pnand %p1192_p1, %p1391_p4 }
  0x4c   : > { %584 = vmatpush.bf16.msra.mxu2 %v914_v38  ;;  %p1198_p8 = por %p1197_p7, %p1196_p12 }
  0x4d   : > { %p1194_p5 = pneg %p1193_p3 }
  0x4e   : > { %667 = vmatpush.bf16.msra.mxu3 %v922_v63 }
  0x4f   : > { %p1199_p9 = pnand %p1198_p8, %p1194_p5 }
  0x50   : > { %585 = vmatpush.bf16.msra.mxu2 %v913_v41 }
  0x52   : > { %668 = vmatpush.bf16.msra.mxu3 %v921_v3 }
  0x54   : > { %586 = vmatpush.bf16.msra.mxu2 %v912_v44 }
  0x56   : > { %669 = vmatpush.bf16.msra.mxu3 %v920_v8 }
  0x58   : > { %587 = vmatpush.bf16.msra.mxu2 %v911_v48 }
  0x5a   : > { %670 = vmatpush.bf16.msra.mxu3 %v919_v12 }
  0x5c   : > { %588 = vmatpush.bf16.msra.mxu2 %v910_v51 }
  0x60   : > { %589 = vmatpush.bf16.msra.mxu2 %v909_v54 }
  0xc6   : > { %v432_v16 = vpop.f32.mrf.mxu0 }
  0xc7   : > { %v433_v17 = vadd.f32 %v432_v16, %v395_v14 }
  0xc8   : > { %v445_v18 = vpop.f32.mrf.mxu1 }
  0xc9   : > { %v449_v19 = vmul.f32 %v433_v17, %v433_v17  ;;  %v1438_v20 = vadd.f32 %v445_v18, %v396_v15 }
  0xcb   : > { %450 = vadd.xlane.f32.xlu0 %v449_v19  ;;  %v464_v21 = vmul.f32 %v1438_v20, %v1438_v20 }
  0xcd   : > { %465 = vadd.xlane.f32.xlu1 %v464_v21 }
  0xce   : > { %v434_v22 = vpop.f32.mrf.mxu0 }
  0xd0   : > { %v447_v23 = vpop.f32.mrf.mxu1 }
  0xd1   : > { %v918_v23 = vld [vmem:[#allocation10 + $0x8] sm:$0xff] }
  0xd2   : > { %671 = vmatpush.bf16.msra.mxu3 %v918_v23 }
 0x13e   : > { %v451_v24 = vpop.xlane.xlu0 %450 }
 0x13f   : > { %v452_v25 = vmax.f32 %v451_v24, 1e-24  ;;  %v917_v24 = vld [vmem:[#allocation10] sm:$0xff] }
 0x140   : > { %v466_v46 = vpop.xlane.xlu1 %465  ;;  %672 = vmatpush.bf16.msra.mxu3 %v917_v24 }
 0x141   : > { %1019 = vrsqrt.f32 %v452_v25  ;;  %vm459_vm2 = vweird.f32 %v452_v25  ;;  %v467_v50 = vmax.f32 %v466_v46, 1e-24 }
 0x143   : > { %1021 = vrsqrt.f32 %v467_v50  ;;  %vm474_vm7 = vweird.f32 %v467_v50 }
 0x147   : > { %v1020_v26 = vpop.eup %1019 }
 0x148   : > { %v454_v27 = vmul.f32 %v1020_v26, %v452_v25  ;;  %vm460_vm1 = vweird.f32 %v1020_v26  ;;  %v1017_v25 = vld [vmem:[%s1496_s5] ss:$0 sm:$0xff] }
 0x149   : > { %vm461_vm3 = vmor %vm459_vm2, %vm460_vm1  ;;  %v1022_v55 = vpop.eup %1021 }
 0x14a   : > { %v455_v28 = vmul.f32 %v1020_v26, %v454_v27  ;;  %v469_v60 = vmul.f32 %v1022_v55, %v467_v50  ;;  %vm475_vm8 = vweird.f32 %v1022_v55 }
 0x14b   : > { %vm476_vm9 = vmor %vm474_vm7, %vm475_vm8 }
 0x14c   : > { %v456_v29 = vmul.f32 0.5, %v455_v28  ;;  %v470_v0 = vmul.f32 %v1022_v55, %v469_v60 }
 0x14e   : > { %v457_v30 = vsub.f32 1.5, %v456_v29  ;;  %v471_v4 = vmul.f32 0.5, %v470_v0 }
 0x150   : > { %v458_v31 = vmul.f32 %v1020_v26, %v457_v30  ;;  %v472_v9 = vsub.f32 1.5, %v471_v4  ;;  %v1018_v30 = vld [vmem:[%s1498_s7] ss:$0 sm:$0xff] }
 0x152   : > { %v462_v33 = vsel %vm461_vm3, %v1020_v26, %v458_v31  ;;  %v473_v13 = vmul.f32 %v1022_v55, %v472_v9 }
 0x153   : > { %v1445_v34 = vmul.f32 %v462_v33, %v433_v17 }
 0x154   : > { %v477_v16 = vsel %vm476_vm9, %v1022_v55, %v473_v13 }
 0x155   : > { %v483_v35 = vmul.f32 %v1016_v32, %v1445_v34  ;;  %v478_v18 = vmul.f32 %v477_v16, %v1438_v20 }
 0x157   : > { %484 = vadd.xlane.f32.xlu0 %v483_v35 }
 0x1ca   : > { %v485_v39 = vpop.xlane.xlu0 %484 }
 0x1cb   : > { %v486_v40 = vmul.f32 %v485_v39, %v485_v39 }
 0x1cd   : > { %v487_v42 = vrot.slane %v486_v40, 4 }
 0x1cf   : > { %v488_v43 = vadd.f32 %v487_v42, %v486_v40 }
 0x1d1   : > { %v489_v45 = vrot.slane %v488_v43, 2 }
 0x1d3   : > { %v490_v47 = vadd.f32 %v489_v45, %v488_v43 }
 0x1d5   : > { %v491_v49 = vrot.slane %v490_v47, 1 }
 0x1d7   : > { %v492_v52 = vadd.f32 %v491_v49, %v490_v47 }
 0x1d9   : > { %v493_v53 = vmax.f32 %v492_v52, 1e-24 }
 0x1db   : > { %1023 = vrsqrt.f32 %v493_v53  ;;  %vm500_vm5 = vweird.f32 %v493_v53 }
 0x1e1   : > { %v1024_v56 = vpop.eup %1023 }
 0x1e2   : > { %v495_v58 = vmul.f32 %v1024_v56, %v493_v53  ;;  %vm501_vm4 = vweird.f32 %v1024_v56 }
 0x1e3   : > { %vm502_vm6 = vmor %vm500_vm5, %vm501_vm4 }
 0x1e4   : > { %v496_v61 = vmul.f32 %v1024_v56, %v495_v58 }
 0x1e6   : > { %v497_v62 = vmul.f32 0.5, %v496_v61 }
 0x1e8   : > { %v498_v1 = vsub.f32 1.5, %v497_v62 }
 0x1ea   : > { %v499_v2 = vmul.f32 %v1024_v56, %v498_v1 }
 0x1ec   : > { %v503_v5 = vsel %vm502_vm6, %v1024_v56, %v499_v2 }
 0x1ed   : > { %v504_v6 = vmul.f32 %v503_v5, %v485_v39 }
 0x1ef   : > { %v505_v7 = vmul.f32 %v504_v6, %v1445_v34 }
 0x1f1   : > { %v506_v10 = vrot.slane %v505_v7, 4 }
 0x1f3   : > { %v507_v11 = vadd.f32 %v506_v10, %v505_v7 }
 0x1f5   : > { %v508_v14 = vrot.slane %v507_v11, 2 }
 0x1f7   : > { %v509_v15 = vadd.f32 %v508_v14, %v507_v11 }
 0x1f9   : > { %v510_v17 = vrot.slane %v509_v15, 1 }
 0x1fb   : > { %v511_v19 = vadd.f32 %v510_v17, %v509_v15 }
 0x1fd   : > { %v512_v21 = vmul.f32 %v511_v19, %v478_v18 }
 0x1ff   : > { %v513_v22 = vpack.c.bf16 %v512_v21, %v512_v21 }
 0x201   : > { %590 = vmatmul.bf16.vlgmr.msra.gmra.mxu2 %v513_v22 }
 0x284   : > { %v591_v26 = vpop.f32.mrf.mxu2 }
 0x285   : > { %v592_v27 = vadd.f32 %v1017_v25, %v591_v26 }
 0x287   : > { %v595_v28 = vadd.f32 %v592_v27, %v1445_v34 }
 0x289   : > { %v596_v20 = vpack.c.bf16 %v595_v28, %v595_v28 }
 0x28b   : > { %673 = vmatmul.bf16.vlgmr.msra.gmra.mxu3 %v596_v20 }
 0x28c   : > { %v593_v29 = vpop.f32.mrf.mxu2 }
 0x30e   : > { %v674_v31 = vpop.f32.mrf.mxu3 }
 0x30f   : > { %v675_v32 = vadd.f32 %v1018_v30, %v674_v31 }
 0x311   : > { %678 = vst [vmem:[%s386_s10] sm:$0xff] %v675_v32 }
 0x312   : > { %1202 = shalt.err (!%p1199_p9)
}
 0x313   : > { %943 = dma.vmem_to_hbm [thread:$0]  (%p1391_p4), %s693_s18, 128, %s695_s20, %s680_s11  }
 0x316   : > { %v676_v33 = vpop.f32.mrf.mxu3 }
 0x317 PF: > { %s706_s24 = sand.u32 1, %s1237_s27   ;;  %p1513_p10 = scmp.ge.s32.totalorder %s1249_s30, 2 }
 0x318   : > { %s707_s26 = scalar_lea.sflag [#allocation4], %s706_s24 }
 0x319   : > { %p963_p13 = pnand %p1513_p10, %p1395_p6 }
 0x31b   : > { %p964_p11 = pneg %p963_p13 }
 0x31d   : > { %1232 = dma.done.wait (%p964_p11), %s707_s26, 128  }
 0x31e   : > { %1234 = vsyncadd (%p964_p11), %s707_s26, 4294967168  ;;  %p23_p0 = scmp.ge.s32.totalorder %s1365_s22, 4   ;;  %s1514_s27 = smov %s1241_s28 }
 0x31f   : > { %s1515_s28 = smov %s1245_s29  ;;  %s1516_s29 = smov %s1376_s9 }
 0x320   : > { %s1517_s30 = smov %s1365_s22  ;;  %25 = sbr.rel (!%p23_p0) target bundleno = 11 (0xb), region = 113 }
 0x325   :  { %713 = vsyncpa [#allocation3], 1 }
 0x326   :  { %715 = vsyncpa [#allocation3 + $0x1], 1 }
 0x327   :  { %716 = vsyncpa [#allocation6], 1 }
 0x328   :  { %717 = vsyncpa [#allocation9], 1 }
 0x329   :  { %718 = vsyncpa [#allocation4], 1 }
 0x32a   :  { %720 = vsyncpa [#allocation4 + $0x1], 1 }

// kernel: tpu_custom_call.1
= control target key start
LH: loop header
LB: loop body
LE: loop exit
PB: predicated region body
PF: predicated region fallthrough
CT: control target
= control target key end

     0   :  { %s1491_s0 = inlined_call_operand.hbm [shape: bf16[2,8,32], index: 0, kind: input, shape index: {}]   ;;  %s1492_s1 = inlined_call_operand.hbm [shape: bf16[32,256], index: 1, kind: input, shape index: {}]   ;;  %s1493_s2 = inlined_call_operand.hbm [shape: f32[1,256], index: 2, kind: input, shape index: {}]   ;;  %s1494_s3 = inlined_call_operand.vmem [shape: f32[1,128], index: 3, kind: input, shape index: {}]   ;;  %s1495_s4 = inlined_call_operand.hbm [shape: bf16[128,128], index: 4, kind: input, shape index: {}]   ;;  %s1496_s5 = inlined_call_operand.vmem [shape: f32[1,128], index: 5, kind: input, shape index: {}]   ;;  %s1497_s6 = inlined_call_operand.hbm [shape: bf16[128,128], index: 6, kind: input, shape index: {}]   ;;  %s1498_s7 = inlined_call_operand.vmem [shape: f32[1,128], index: 7, kind: input, shape index: {}]   ;;  %s1499_s8 = inlined_call_operand.hbm [shape: f32[2,8,128], index: 8, kind: output, shape index: {}]  }
   0x1   :  { %1500 = sst [smem:[#allocation16_spill]] %s1492_s1 }
   0x2   :  { %1501 = sst [smem:[#allocation17_spill]] %s1493_s2 }
   0x3   :  { %1502 = sst [smem:[#allocation18_spill]] %s1495_s4 }
   0x4   :  { %13 = vsyncpa [#allocation3], 0 }
   0x5   :  { %15 = vsyncpa [#allocation3 + $0x1], 0 }
   0x6   :  { %16 = vsyncpa [#allocation6], 0 }
   0x7   :  { %17 = vsyncpa [#allocation9], 0 }
   0x8   :  { %18 = vsyncpa [#allocation4], 0 }
   0x9   :  { %20 = vsyncpa [#allocation4 + $0x1], 0  ;;  %s1304_s27 = smov 0   ;;  %s1306_s28 = smov 0  }
   0xa   :  { %s1308_s29 = smov 0   ;;  %s1310_s30 = smov 0  }
   0xb LB: > { %s1503_s1 = sld [smem:[#allocation16_spill]]  ;;  %s1328_s12 = sadd.s32 4294967295, %s1249_s30   ;;  %s1249_s30 = sphi %s1310_s30, %s1517_s30   ;;  %s1245_s29 = sphi %s1308_s29, %s1516_s29   ;;  %s1241_s28 = sphi %s1306_s28, %s1515_s28   ;;  %s1237_s27 = sphi %s1304_s27, %s1514_s27  }
   0xc   : > { %p804_p0 = scmp.ge.s32.totalorder %s1249_s30, 1  ;;  %p47_p1 = scmp.eq.s32.totalorder %s1328_s12, 0 }
   0xd   : > { %p230_p2 = scmp.lt.s32.totalorder %s1249_s30, 3  ;;  %s1251_s14 = smov [#allocation5]  }
   0xe   : > { %s243_s15 = sshll.u32 %s1251_s14, 4  ;;  %s1505_s4 = sld [smem:[#allocation18_spill]]  ;;  %s244_s15 = int_to_ptr.vmem [resolvable:$true] %s243_s15 }
   0xf   : > { %p1333_p3 = pnand %p804_p0, %p230_p2  ;;  %s1252_s20 = smov [#allocation8]  }
  0x10   : > { %s272_s21 = sshll.u32 %s1252_s20, 4  ;;  %s1253_s22 = smov 128   ;;  %s273_s21 = int_to_ptr.vmem [resolvable:$true] %s272_s21 }
  0x11   : > { %s241_s11 = sshll.u32 %s1503_s1, 4  ;;  %p945_p4 = pneg %p1333_p3  ;;  %s242_s11 = int_to_ptr.hbm [resolvable:$true] %s241_s11 }
  0x12   : > { %s1254_s23 = smov 8   ;;  %s1255_s24 = smov 64  }
  0x13   : > { %p1345_p6 = pnand %p945_p4, %p47_p1  ;;  %s1256_s25 = smov 4  }
  0x14   : > { %s270_s18 = sshll.u32 %s1505_s4, 4  ;;  %s1507_s2 = sld [smem:[#allocation17_spill]]  ;;  %s271_s18 = int_to_ptr.hbm [resolvable:$true] %s270_s18 }
  0x15   : > { %948 = dma.hbm_to_vmem [thread:$0]  (!%p1345_p6), %s242_s11, 512, %s244_s15, [#allocation6], %s1253_s22, %s1253_s22, %s1254_s23  }
  0x16   : > { %954 = dma.hbm_to_vmem [thread:$0]  (!%p1345_p6), %s271_s18, 1024, %s273_s21, [#allocation9], %s1255_s24, %s1255_s24, %s1256_s25  }
  0x17   : > { %s1257_s14 = smov [#allocation7]   ;;  %s287_s17 = sshll.u32 %s1497_s6, 4  ;;  %s288_s17 = int_to_ptr.hbm [resolvable:$true] %s287_s17 }
  0x18   : > { %s258_s11 = sshll.u32 %s1257_s14, 4  ;;  %s1258_s18 = smov [#allocation10]   ;;  %s259_s11 = int_to_ptr.vmem [resolvable:$true] %s258_s11 }
  0x19   : > { %s289_s20 = sshll.u32 %s1258_s18, 4  ;;  %s803_s21 = sadd.s32 4294967294, %s1249_s30   ;;  %s290_s20 = int_to_ptr.vmem [resolvable:$true] %s289_s20 }
  0x1a   : > { %s256_s10 = sshll.u32 %s1507_s2, 4  ;;  %s1365_s22 = sadd.s32 1, %s1249_s30   ;;  %s257_s10 = int_to_ptr.hbm [resolvable:$true] %s256_s10 }
  0x1b   : > { %951 = dma.hbm_to_vmem [thread:$0]  (!%p1345_p6), %s257_s10, 32, %s259_s11, [#allocation6]  }
  0x1c   : > { %957 = dma.hbm_to_vmem [thread:$0]  (!%p1345_p6), %s288_s17, 1024, %s290_s20, [#allocation9], %s1255_s24, %s1255_s24, %s1256_s25  }
  0x1d   : > { %s30_s23 = ssub.s32 %s1249_s30, %s1365_s22  ;;  %s33_s26 = sadd.s32 1, %s1245_s29 }
  0x1e   : > { %p31_p7 = scmp.eq.s32.totalorder %s30_s23, 0  ;;  %p40_p8 = scmp.ne.s32.totalorder %s1245_s29, %s1241_s28 }
  0x1f   : > { %p41_p9 = scmp.eq.s32.totalorder %s1249_s30, 0  ;;  %p46_p10 = scmp.ne.s32.totalorder %s1241_s28, %s1237_s27 }
  0x20   : > { %s1376_s9 = scalar_select %p31_p7, %s1245_s29, %s33_s26  }
  0x21   : > { %p1378_p11 = por %p41_p9, %p40_p8  ;;  %p1384_p12 = por %p47_p1, %p46_p10 }
  0x22   : > { %p217_p13 = scmp.eq.s32.totalorder %s1328_s12, 1  ;;  %p223_p0 = scmp.eq.s32.totalorder %s803_s21, 1 }
  0x23   : > { %p970_p2 = scmp.lt.s32.totalorder %s1249_s30, 2  ;;  %s306_s24 = sand.u32 1, %s1245_s29  }
  0x24   : > { %p1391_p4 = por %p217_p13, %p40_p8  ;;  %p1395_p6 = por %p223_p0, %p46_p10 }
  0x25   : > { %s810_s11 = sshll.u32 %s306_s24, 2  ;;  %s811_s15 = sshll.u32 %s1249_s30, 2 }
  0x26   : > { %s314_s18 = scalar_lea.hbm %s1491_s0, %s811_s15  ;;  %s310_s20 = scalar_lea.vmem [#allocation2], %s810_s11 }
  0x27   : > { %s318_s23 = sshll.u32 %s310_s20, 4  ;;  %s316_s26 = sshll.u32 %s314_s18, 4  ;;  %s319_s23 = int_to_ptr.vmem [resolvable:$true] %s318_s23  ;;  %s317_s26 = int_to_ptr.hbm [resolvable:$true] %s316_s26 }
  0x28   : > { %p1405_p7 = pnand %p970_p2, %p1378_p11  ;;  %s307_s1 = scalar_lea.sflag [#allocation3], %s306_s24 }
  0x29   : > { %s1145_s2 = sshra.s32 %s317_s26, 4  ;;  %s1152_s16 = scalar_lea.hbm %s1491_s0, 8  ;;  %s1146_s2 = int_to_ptr.hbm [resolvable:$true] %s1145_s2 }
  0x2a   : > { %s1147_s4 = scalar_lea.hbm %s1146_s2, 4  ;;  %p1149_p9 = pneg %p1405_p7 }
  0x2b   : > { %p1148_p8 = scmp.ne.s32.totalorder %s1146_s2, %s1147_s4  ;;  %p1153_p11 = scmp.lt.s32.totalorder %s1146_s2, %s1491_s0 }
  0x2c   : > { %p1154_p0 = scmp.lt.s32.totalorder %s1152_s16, %s1147_s4 }
  0x2d   : > { %p1150_p10 = pnand %p1149_p9, %p1148_p8 }
  0x2e   : > { %p1155_p2 = por %p1154_p0, %p1153_p11 }
  0x2f   : > { %p1151_p13 = pneg %p1150_p10 }
  0x31   : > { %p1156_p5 = pnand %p1155_p2, %p1151_p13 }
  0x33   : > { %1159 = shalt.err (!%p1156_p5)
}
  0x34   : > { %961 = dma.hbm_to_vmem [thread:$0]  (!%p1405_p7), %s317_s26, 64, %s319_s23, %s307_s1  }
  0x35   : > { %327 = sbr.rel (%p1333_p3) target bundleno = 791 (0x317), region = 52  ;;  %s1422_s24 = sand.u32 (!%p1333_p3), 1, %s1241_s28  }
  0x36   : > { %s813_s18 = sshll.u32 (!%p1333_p3), %s1422_s24, 2  ;;  %s330_s20 = scalar_lea.sflag (!%p1333_p3), [#allocation3], %s1422_s24 }
  0x37   : > { %s333_s11 = scalar_lea.vmem (!%p1333_p3), [#allocation2], %s813_s18 }
  0x3a   : > { %1220 = dma.done.wait (%p1384_p12), %s330_s20, 64  }
  0x3b   : > { %1222 = vsyncadd (%p1384_p12), %s330_s20, 4294967232 }
  0x3c   : > { %1224 = dma.done.wait (%p47_p1), [#allocation6], 544  }
  0x3d   : > { %1226 = vsyncadd (%p47_p1), [#allocation6], 4294966752 }
  0x3e   : > { %1228 = dma.done.wait (%p47_p1), [#allocation9], 2048  }
  0x3f   : > { %1230 = vsyncadd (%p47_p1), [#allocation9], 4294965248  ;;  %v829_v0 = vld [vmem:[#allocation5 + $0x10] sm:$0xf]  ;;  %v908_v1 = vld [vmem:[#allocation5 + $0x14] sm:$0xf0] }
  0x40   : > { %v821_v2 = vld [vmem:[#allocation5] sm:$0xf]  ;;  %v830_v3 = vor.u32 %v908_v1, %v829_v0  ;;  %v906_v4 = vld [vmem:[#allocation5 + $0x4] sm:$0xf0]  ;;  %v907_v5 = vld [vmem:[#allocation5 + $0x14] sm:$0xf] }
  0x41   : > { %v831_v6 = vld [vmem:[#allocation5 + $0x18] sm:$0xf0]  ;;  %v905_v7 = vld [vmem:[#allocation5 + $0x4] sm:$0xf]  ;;  %v823_v8 = vld [vmem:[#allocation5 + $0x8] sm:$0xf0]  ;;  %v822_v9 = vor.u32 %v906_v4, %v821_v2 }
  0x42   : > { %429 = vmatpush.bf16.msra.mxu0 %v830_v3  ;;  %v834_v10 = vor.u32 %v907_v5, %v831_v6  ;;  %v826_v11 = vor.u32 %v905_v7, %v823_v8  ;;  %v388_v12 = vld [vmem:[%s333_s11] sm:$0xf]  ;;  %vm419_vm0 = vcmask 261120   ;;  %v393_v13 = vld [vmem:[#allocation7] sm:$0x3]  ;;  %v914_v38 = vld [vmem:[#allocation8 + $0x28] sm:$0xff] }
  0x43   : > { %v395_v14 = vperm.slane %v393_v13, 0  ;;  %v396_v15 = vperm.slane %v393_v13, 1  ;;  %v1016_v32 = vld [vmem:[%s1494_s3] ss:$0 sm:$0xff]  ;;  %v916_v36 = vld [vmem:[#allocation8 + $0x38] sm:$0xff]  ;;  %v913_v41 = vld [vmem:[#allocation8 + $0x20] sm:$0xff] }
  0x44   : > { %442 = vmatpush.bf16.msra.mxu1 %v834_v10  ;;  %582 = vmatpush.bf16.msra.mxu2 %v916_v36  ;;  %v915_v37 = vld [vmem:[#allocation8 + $0x30] sm:$0xff]  ;;  %v912_v44 = vld [vmem:[#allocation8 + $0x18] sm:$0xff]  ;;  %v910_v51 = vld [vmem:[#allocation8 + $0x8] sm:$0xff]  ;;  %s902_s19 = sshll.u32 %s1328_s12, 3  ;;  %s818_s23 = sshll.u32 %s1422_s24, 3 }
  0x45   : > { %v911_v48 = vld [vmem:[#allocation8 + $0x10] sm:$0xff]  ;;  %v909_v54 = vld [vmem:[#allocation8] sm:$0xff]  ;;  %v924_v57 = vld [vmem:[#allocation10 + $0x38] sm:$0xff]  ;;  %s690_s15 = scalar_lea.hbm %s1499_s8, %s902_s19  ;;  %s386_s10 = scalar_lea.vmem [#allocation11], %s818_s23 }
  0x46   : > { %430 = vmatpush.bf16.msra.mxu0 %v822_v9  ;;  %665 = vmatpush.bf16.msra.mxu3 %v924_v57  ;;  %v923_v59 = vld [vmem:[#allocation10 + $0x30] sm:$0xff]  ;;  %v922_v63 = vld [vmem:[#allocation10 + $0x28] sm:$0xff]  ;;  %v921_v3 = vld [vmem:[#allocation10 + $0x20] sm:$0xff]  ;;  %s692_s18 = sshll.u32 %s386_s10, 4  ;;  %s694_s20 = sshll.u32 %s690_s15, 4  ;;  %s693_s18 = int_to_ptr.vmem [resolvable:$true] %s692_s18  ;;  %s695_s20 = int_to_ptr.hbm [resolvable:$true] %s694_s20 }
  0x47   : > { %v920_v8 = vld [vmem:[#allocation10 + $0x18] sm:$0xff]  ;;  %s680_s11 = scalar_lea.sflag [#allocation4], %s1422_s24  ;;  %s1189_s12 = sshra.s32 %s695_s20, 4  ;;  %s1190_s12 = int_to_ptr.hbm [resolvable:$true] %s1189_s12 }
  0x48   : > { %443 = vmatpush.bf16.msra.mxu1 %v826_v11  ;;  %583 = vmatpush.bf16.msra.mxu2 %v915_v37  ;;  %s1191_s1 = scalar_lea.hbm %s1190_s12, 8  ;;  %s1195_s13 = scalar_lea.hbm %s1499_s8, 16 }
  0x49   : > { %835 = vmatmul.msk.bf16.vlgmr.msra.gmra.mxu0 %vm419_vm0, %v388_v12  ;;  %p1192_p1 = scmp.ne.s32.totalorder %s1190_s12, %s1191_s1  ;;  %p1196_p12 = scmp.lt.s32.totalorder %s1190_s12, %s1499_s8 }
  0x4a   : > { %666 = vmatpush.bf16.msra.mxu3 %v923_v59  ;;  %p1197_p7 = scmp.lt.s32.totalorder %s1195_s13, %s1191_s1 }
  0x4b   : > { %836 = vmatmul.msk.bf16.vlgmr.msra.gmra.mxu1 %vm419_vm0, %v388_v12  ;;  %v919_v12 = vld [vmem:[#allocation10 + $0x10] sm:$0xff]  ;;  %p1193_p3 = pnand %p1192_p1, %p1391_p4 }
  0x4c   : > { %584 = vmatpush.bf16.msra.mxu2 %v914_v38  ;;  %p1198_p8 = por %p1197_p7, %p1196_p12 }
  0x4d   : > { %p1194_p5 = pneg %p1193_p3 }
  0x4e   : > { %667 = vmatpush.bf16.msra.mxu3 %v922_v63 }
  0x4f   : > { %p1199_p9 = pnand %p1198_p8, %p1194_p5 }
  0x50   : > { %585 = vmatpush.bf16.msra.mxu2 %v913_v41 }
  0x52   : > { %668 = vmatpush.bf16.msra.mxu3 %v921_v3 }
  0x54   : > { %586 = vmatpush.bf16.msra.mxu2 %v912_v44 }
  0x56   : > { %669 = vmatpush.bf16.msra.mxu3 %v920_v8 }
  0x58   : > { %587 = vmatpush.bf16.msra.mxu2 %v911_v48 }
  0x5a   : > { %670 = vmatpush.bf16.msra.mxu3 %v919_v12 }
  0x5c   : > { %588 = vmatpush.bf16.msra.mxu2 %v910_v51 }
  0x60   : > { %589 = vmatpush.bf16.msra.mxu2 %v909_v54 }
  0xc6   : > { %v432_v16 = vpop.f32.mrf.mxu0 }
  0xc7   : > { %v433_v17 = vadd.f32 %v432_v16, %v395_v14 }
  0xc8   : > { %v445_v18 = vpop.f32.mrf.mxu1 }
  0xc9   : > { %v449_v19 = vmul.f32 %v433_v17, %v433_v17  ;;  %v1438_v20 = vadd.f32 %v445_v18, %v396_v15 }
  0xcb   : > { %450 = vadd.xlane.f32.xlu0 %v449_v19  ;;  %v464_v21 = vmul.f32 %v1438_v20, %v1438_v20 }
  0xcd   : > { %465 = vadd.xlane.f32.xlu1 %v464_v21 }
  0xce   : > { %v434_v22 = vpop.f32.mrf.mxu0 }
  0xd0   : > { %v447_v23 = vpop.f32.mrf.mxu1 }
  0xd1   : > { %v918_v23 = vld [vmem:[#allocation10 + $0x8] sm:$0xff] }
  0xd2   : > { %671 = vmatpush.bf16.msra.mxu3 %v918_v23 }
 0x13e   : > { %v451_v24 = vpop.xlane.xlu0 %450 }
 0x13f   : > { %v452_v25 = vmax.f32 %v451_v24, 1e-24  ;;  %v917_v24 = vld [vmem:[#allocation10] sm:$0xff] }
 0x140   : > { %v466_v46 = vpop.xlane.xlu1 %465  ;;  %672 = vmatpush.bf16.msra.mxu3 %v917_v24 }
 0x141   : > { %1019 = vrsqrt.f32 %v452_v25  ;;  %vm459_vm2 = vweird.f32 %v452_v25  ;;  %v467_v50 = vmax.f32 %v466_v46, 1e-24 }
 0x143   : > { %1021 = vrsqrt.f32 %v467_v50  ;;  %vm474_vm7 = vweird.f32 %v467_v50 }
 0x147   : > { %v1020_v26 = vpop.eup %1019 }
 0x148   : > { %v454_v27 = vmul.f32 %v1020_v26, %v452_v25  ;;  %vm460_vm1 = vweird.f32 %v1020_v26  ;;  %v1017_v25 = vld [vmem:[%s1496_s5] ss:$0 sm:$0xff] }
 0x149   : > { %vm461_vm3 = vmor %vm459_vm2, %vm460_vm1  ;;  %v1022_v55 = vpop.eup %1021 }
 0x14a   : > { %v455_v28 = vmul.f32 %v1020_v26, %v454_v27  ;;  %v469_v60 = vmul.f32 %v1022_v55, %v467_v50  ;;  %vm475_vm8 = vweird.f32 %v1022_v55 }
 0x14b   : > { %vm476_vm9 = vmor %vm474_vm7, %vm475_vm8 }
 0x14c   : > { %v456_v29 = vmul.f32 0.5, %v455_v28  ;;  %v470_v0 = vmul.f32 %v1022_v55, %v469_v60 }
 0x14e   : > { %v457_v30 = vsub.f32 1.5, %v456_v29  ;;  %v471_v4 = vmul.f32 0.5, %v470_v0 }
 0x150   : > { %v458_v31 = vmul.f32 %v1020_v26, %v457_v30  ;;  %v472_v9 = vsub.f32 1.5, %v471_v4  ;;  %v1018_v30 = vld [vmem:[%s1498_s7] ss:$0 sm:$0xff] }
 0x152   : > { %v462_v33 = vsel %vm461_vm3, %v1020_v26, %v458_v31  ;;  %v473_v13 = vmul.f32 %v1022_v55, %v472_v9 }
 0x153   : > { %v1445_v34 = vmul.f32 %v462_v33, %v433_v17 }
 0x154   : > { %v477_v16 = vsel %vm476_vm9, %v1022_v55, %v473_v13 }
 0x155   : > { %v483_v35 = vmul.f32 %v1016_v32, %v1445_v34  ;;  %v478_v18 = vmul.f32 %v477_v16, %v1438_v20 }
 0x157   : > { %484 = vadd.xlane.f32.xlu0 %v483_v35 }
 0x1ca   : > { %v485_v39 = vpop.xlane.xlu0 %484 }
 0x1cb   : > { %v486_v40 = vmul.f32 %v485_v39, %v485_v39 }
 0x1cd   : > { %v487_v42 = vrot.slane %v486_v40, 4 }
 0x1cf   : > { %v488_v43 = vadd.f32 %v487_v42, %v486_v40 }
 0x1d1   : > { %v489_v45 = vrot.slane %v488_v43, 2 }
 0x1d3   : > { %v490_v47 = vadd.f32 %v489_v45, %v488_v43 }
 0x1d5   : > { %v491_v49 = vrot.slane %v490_v47, 1 }
 0x1d7   : > { %v492_v52 = vadd.f32 %v491_v49, %v490_v47 }
 0x1d9   : > { %v493_v53 = vmax.f32 %v492_v52, 1e-24 }
 0x1db   : > { %1023 = vrsqrt.f32 %v493_v53  ;;  %vm500_vm5 = vweird.f32 %v493_v53 }
 0x1e1   : > { %v1024_v56 = vpop.eup %1023 }
 0x1e2   : > { %v495_v58 = vmul.f32 %v1024_v56, %v493_v53  ;;  %vm501_vm4 = vweird.f32 %v1024_v56 }
 0x1e3   : > { %vm502_vm6 = vmor %vm500_vm5, %vm501_vm4 }
 0x1e4   : > { %v496_v61 = vmul.f32 %v1024_v56, %v495_v58 }
 0x1e6   : > { %v497_v62 = vmul.f32 0.5, %v496_v61 }
 0x1e8   : > { %v498_v1 = vsub.f32 1.5, %v497_v62 }
 0x1ea   : > { %v499_v2 = vmul.f32 %v1024_v56, %v498_v1 }
 0x1ec   : > { %v503_v5 = vsel %vm502_vm6, %v1024_v56, %v499_v2 }
 0x1ed   : > { %v504_v6 = vmul.f32 %v503_v5, %v485_v39 }
 0x1ef   : > { %v505_v7 = vmul.f32 %v504_v6, %v1445_v34 }
 0x1f1   : > { %v506_v10 = vrot.slane %v505_v7, 4 }
 0x1f3   : > { %v507_v11 = vadd.f32 %v506_v10, %v505_v7 }
 0x1f5   : > { %v508_v14 = vrot.slane %v507_v11, 2 }
 0x1f7   : > { %v509_v15 = vadd.f32 %v508_v14, %v507_v11 }
 0x1f9   : > { %v510_v17 = vrot.slane %v509_v15, 1 }
 0x1fb   : > { %v511_v19 = vadd.f32 %v510_v17, %v509_v15 }
 0x1fd   : > { %v512_v21 = vmul.f32 %v511_v19, %v478_v18 }
 0x1ff   : > { %v513_v22 = vpack.c.bf16 %v512_v21, %v512_v21 }
 0x201   : > { %590 = vmatmul.bf16.vlgmr.msra.gmra.mxu2 %v513_v22 }
 0x284   : > { %v591_v26 = vpop.f32.mrf.mxu2 }
 0x285   : > { %v592_v27 = vadd.f32 %v1017_v25, %v591_v26 }
 0x287   : > { %v595_v28 = vadd.f32 %v592_v27, %v1445_v34 }
 0x289   : > { %v596_v20 = vpack.c.bf16 %v595_v28, %v595_v28 }
 0x28b   : > { %673 = vmatmul.bf16.vlgmr.msra.gmra.mxu3 %v596_v20 }
 0x28c   : > { %v593_v29 = vpop.f32.mrf.mxu2 }
 0x30e   : > { %v674_v31 = vpop.f32.mrf.mxu3 }
 0x30f   : > { %v675_v32 = vadd.f32 %v1018_v30, %v674_v31 }
 0x311   : > { %678 = vst [vmem:[%s386_s10] sm:$0xff] %v675_v32 }
 0x312   : > { %1202 = shalt.err (!%p1199_p9)
}
 0x313   : > { %943 = dma.vmem_to_hbm [thread:$0]  (%p1391_p4), %s693_s18, 128, %s695_s20, %s680_s11  }
 0x316   : > { %v676_v33 = vpop.f32.mrf.mxu3 }
 0x317 PF: > { %s706_s24 = sand.u32 1, %s1237_s27   ;;  %p1513_p10 = scmp.ge.s32.totalorder %s1249_s30, 2 }
 0x318   : > { %s707_s26 = scalar_lea.sflag [#allocation4], %s706_s24 }
 0x319   : > { %p963_p13 = pnand %p1513_p10, %p1395_p6 }
 0x31b   : > { %p964_p11 = pneg %p963_p13 }
 0x31d   : > { %1232 = dma.done.wait (%p964_p11), %s707_s26, 128  }
 0x31e   : > { %1234 = vsyncadd (%p964_p11), %s707_s26, 4294967168  ;;  %p23_p0 = scmp.ge.s32.totalorder %s1365_s22, 4   ;;  %s1514_s27 = smov %s1241_s28 }
 0x31f   : > { %s1515_s28 = smov %s1245_s29  ;;  %s1516_s29 = smov %s1376_s9 }
 0x320   : > { %s1517_s30 = smov %s1365_s22  ;;  %25 = sbr.rel (!%p23_p0) target bundleno = 11 (0xb), region = 113 }
 0x325   :  { %713 = vsyncpa [#allocation3], 1 }
 0x326   :  { %715 = vsyncpa [#allocation3 + $0x1], 1 }
 0x327   :  { %716 = vsyncpa [#allocation6], 1 }
 0x328   :  { %717 = vsyncpa [#allocation9], 1 }
 0x329   :  { %718 = vsyncpa [#allocation4], 1 }
 0x32a   :  { %720 = vsyncpa [#allocation4 + $0x1], 1 }

</bundles_post_ra>
